<compile_context>
chip_gen: v7x
topology: tpu7x:2x2x1
jax: 0.10.0
libtpu: 0.0.40
codegen_flags: <defaults>
</compile_context>

<pallas_src>
import jax
import jax.numpy as jnp
from jax.experimental import pallas as pl
from jax.experimental.pallas import tpu as pltpu


def gru_seq_kernel(ids_ref, h0_ref, emb_tab_ref, w4_ref, b4_ref,
                   wout_ref, bout_ref, logp_ref, hout_ref, h_scr):
    """One grid step == one GRU time step; hidden state carried in VMEM scratch."""
    t = pl.program_id(0)

    @pl.when(t == 0)
    def _init():
        h_scr[...] = h0_ref[...]

    # ---- in-kernel embedding gather via one-hot matmul on the MXU ----
    ids = ids_ref[...]                                      # (B, 1) int32
    B = ids.shape[0]
    V = emb_tab_ref.shape[0]
    onehot = (ids == jax.lax.broadcasted_iota(jnp.int32, (B, V), 1)
              ).astype(jnp.float32)                         # (B, V)
    emb = jnp.dot(onehot, emb_tab_ref[...],
                  preferred_element_type=jnp.float32)       # (B, E)

    # ---- fused GRU gates: single (B, E+H) @ (E+H, 4H) matmul ----
    h = h_scr[...]                                          # (B, H)
    H = h.shape[-1]
    xh = jnp.concatenate([emb, h], axis=-1)                 # (B, E+H)
    g = jnp.dot(xh, w4_ref[...],
                preferred_element_type=jnp.float32) + b4_ref[...]   # (B, 4H)

    r = jax.nn.sigmoid(g[:, 0:H])                           # pre-summed bias
    z = jax.nn.sigmoid(g[:, H:2 * H])
    i_n = g[:, 2 * H:3 * H]                                 # W_in x + b_in
    h_n = g[:, 3 * H:4 * H]                                 # W_hn h + b_hn
    n = jnp.tanh(i_n + r * h_n)
    h_new = (1.0 - z) * n + z * h

    h_scr[...] = h_new
    hout_ref[...] = h_new                                   # resident output

    # ---- gru2out linear + log_softmax (lane-dense V=128 output) ----
    logits = jnp.dot(h_new, wout_ref[...],
                     preferred_element_type=jnp.float32) + bout_ref[...]
    m = jnp.max(logits, axis=-1, keepdims=True)
    shifted = logits - m
    lse = jnp.log(jnp.sum(jnp.exp(shifted), axis=-1, keepdims=True))
    logp_ref[...] = shifted - lse


def generator_sequence_forward(xs, hidden, params):
    """
    Fused multi-step forward (what sample()/batchNLLLoss() loop over).
    xs:     (T, B) int32 token ids
    hidden: (1, B, H) float32
    returns (log_probs (T, B, V), hidden' (1, B, H))
    """
    emb_table = params["embeddings"]                        # (V, E)
    w4 = params["w4"]                                       # (E+H, 4H)
    b4 = params["b4"]                                       # (1, 4H)
    w_out_t = params["w_out_t"]                             # (H, V)
    b_out = params["b_out_row"]                             # (1, V)

    T, B = xs.shape
    V, E = emb_table.shape
    H = w_out_t.shape[0]
    h0 = hidden.reshape(B, H).astype(jnp.float32)

    logp, h_new = pl.pallas_call(
        gru_seq_kernel,
        out_shape=(
            jax.ShapeDtypeStruct((T, B, V), jnp.float32),
            jax.ShapeDtypeStruct((B, H), jnp.float32),
        ),
        grid=(T,),
        in_specs=[
            pl.BlockSpec((None, B, 1), lambda t: (t, 0, 0)),     # token ids (per step)
            pl.BlockSpec((B, H), lambda t: (0, 0)),              # h0 (resident)
            pl.BlockSpec((V, E), lambda t: (0, 0)),              # embedding table (resident)
            pl.BlockSpec((E + H, 4 * H), lambda t: (0, 0)),      # fused GRU weights (resident)
            pl.BlockSpec((1, 4 * H), lambda t: (0, 0)),          # fused GRU bias (resident)
            pl.BlockSpec((H, V), lambda t: (0, 0)),              # output proj (resident)
            pl.BlockSpec((1, V), lambda t: (0, 0)),              # output bias (resident)
        ],
        out_specs=(
            pl.BlockSpec((None, B, V), lambda t: (t, 0, 0)),     # log-probs per step
            pl.BlockSpec((B, H), lambda t: (0, 0)),              # final hidden (resident)
        ),
        scratch_shapes=[pltpu.VMEM((B, H), jnp.float32)],        # hidden-state carry
        compiler_params=pltpu.CompilerParams(
            dimension_semantics=("arbitrary",)),
    )(xs.reshape(T, B, 1), h0, emb_table, w4, b4, w_out_t, b_out)

    return logp, h_new.reshape(1, B, H)


def generator_forward(x, hidden, params):
    """Single-step forward matching the PyTorch module's forward(x, hidden)."""
    logp, h_new = generator_sequence_forward(x[None, :], hidden, params)
    return logp[0], h_new


def init_params(key, vocab_size, embedding_dim, hidden_dim):
    """Deterministic synthetic params in PyTorch layout + fused kernel layout."""
    ks = jax.random.split(key, 7)
    scale = 0.1
    E, H, V = embedding_dim, hidden_dim, vocab_size
    emb = jax.random.normal(ks[0], (V, E), jnp.float32)
    w_ih = scale * jax.random.normal(ks[1], (3 * H, E), jnp.float32)   # [r|z|n] rows
    w_hh = scale * jax.random.normal(ks[2], (3 * H, H), jnp.float32)
    b_ih = scale * jax.random.normal(ks[3], (3 * H,), jnp.float32)
    b_hh = scale * jax.random.normal(ks[4], (3 * H,), jnp.float32)
    w_out = scale * jax.random.normal(ks[5], (V, H), jnp.float32)
    b_out = scale * jax.random.normal(ks[6], (V,), jnp.float32)

    # Fused (E+H, 4H) weight: columns = [r, z, i_n, h_n]; input rows on top,
    # hidden rows below; zero-pad so i_n has no h-contribution and h_n no x-contribution.
    w_ih_r, w_ih_z, w_ih_n = w_ih[0:H], w_ih[H:2 * H], w_ih[2 * H:3 * H]
    w_hh_r, w_hh_z, w_hh_n = w_hh[0:H], w_hh[H:2 * H], w_hh[2 * H:3 * H]
    top = jnp.concatenate(
        [w_ih_r.T, w_ih_z.T, w_ih_n.T, jnp.zeros((E, H), jnp.float32)], axis=1)   # (E, 4H)
    bot = jnp.concatenate(
        [w_hh_r.T, w_hh_z.T, jnp.zeros((H, H), jnp.float32), w_hh_n.T], axis=1)   # (H, 4H)
    w4 = jnp.concatenate([top, bot], axis=0)                                      # (E+H, 4H)
    b4 = jnp.concatenate(
        [b_ih[0:H] + b_hh[0:H],            # r: pre-summed bias
         b_ih[H:2 * H] + b_hh[H:2 * H],    # z: pre-summed bias
         b_ih[2 * H:3 * H],                # i_n bias
         b_hh[2 * H:3 * H]]                # h_n bias (kept separate: multiplied by r)
    ).reshape(1, 4 * H)

    return {
        # raw (PyTorch-layout) params, used by the pure-JAX reference
        "embeddings": emb, "w_ih": w_ih, "w_hh": w_hh,
        "b_ih": b_ih, "b_hh": b_hh, "w_out": w_out, "b_out": b_out,
        # fused / kernel-layout params
        "w4": w4, "b4": b4,
        "w_out_t": w_out.T,                # (H, V)
        "b_out_row": b_out.reshape(1, -1), # (1, V)
    }


def reference_forward(x, hidden, params):
    """Pure-JAX reference mirroring PyTorch GRU + log_softmax semantics."""
    emb = jnp.take(params["embeddings"], x, axis=0)
    h = hidden[0]
    H = h.shape[-1]
    gi = emb @ params["w_ih"].T + params["b_ih"]
    gh = h @ params["w_hh"].T + params["b_hh"]
    r = jax.nn.sigmoid(gi[:, :H] + gh[:, :H])
    z = jax.nn.sigmoid(gi[:, H:2 * H] + gh[:, H:2 * H])
    n = jnp.tanh(gi[:, 2 * H:] + r * gh[:, 2 * H:])
    h_new = (1 - z) * n + z * h
    logits = h_new @ params["w_out"].T + params["b_out"]
    return jax.nn.log_softmax(logits, axis=1), h_new[None]


def reference_sequence_forward(xs, hidden, params):
    h = hidden
    outs = []
    for t in range(xs.shape[0]):
        logp, h = reference_forward(xs[t], h, params)
        outs.append(logp)
    return jnp.stack(outs, axis=0), h


if __name__ == "__main__":
    # Small shapes consistent with the module: batch=8, emb=32, hidden=32,
    # vocab=128, max_seq_len=8.
    B, E, H, V, T = 8, 32, 32, 128, 8
    key = jax.random.PRNGKey(0)
    k_par, k_x, k_seq = jax.random.split(key, 3)

    params = init_params(k_par, vocab_size=V, embedding_dim=E, hidden_dim=H)
    hidden0 = jnp.zeros((1, B, H), jnp.float32)            # init_hidden

    # ---- fused multi-step forward (the per-token loop moved into the kernel) ----
    xs = jax.random.randint(k_seq, (T, B), 0, V, dtype=jnp.int32)
    logp_seq, h_seq = generator_sequence_forward(xs, hidden0, params)
    jax.block_until_ready((logp_seq, h_seq))
    logp_seq_ref, h_seq_ref = reference_sequence_forward(xs, hidden0, params)
    assert logp_seq.shape == (T, B, V) and h_seq.shape == (1, B, H)
    assert jnp.allclose(logp_seq, logp_seq_ref, atol=1e-5, rtol=1e-5)
    assert jnp.allclose(h_seq, h_seq_ref, atol=1e-5, rtol=1e-5)

    # ---- single-step forward matching the module's forward(x, hidden) ----
    x = jax.random.randint(k_x, (B,), 0, V, dtype=jnp.int32)
    logp, h_new = generator_forward(x, h_seq, params)       # nonzero hidden carry
    jax.block_until_ready((logp, h_new))
    logp_ref, h_ref = reference_forward(x, h_seq, params)
    assert logp.shape == (B, V) and h_new.shape == (1, B, H)
    assert jnp.allclose(logp, logp_ref, atol=1e-5, rtol=1e-5)
    assert jnp.allclose(h_new, h_ref, atol=1e-5, rtol=1e-5)

    print("KERNEL_OK")
</pallas_src>

<mosaic_0001>
module attributes {stable_mosaic.version = 11 : i64} {
  func.func @gru_seq_kernel(%arg0: i32, %arg1: memref<1x8x1xi32, #tpu.memory_space<vmem>>, %arg2: memref<8x32xf32, #tpu.memory_space<vmem>>, %arg3: memref<128x32xf32, #tpu.memory_space<vmem>>, %arg4: memref<64x128xf32, #tpu.memory_space<vmem>>, %arg5: memref<1x128xf32, #tpu.memory_space<vmem>>, %arg6: memref<32x128xf32, #tpu.memory_space<vmem>>, %arg7: memref<1x128xf32, #tpu.memory_space<vmem>>, %arg8: memref<1x8x128xf32, #tpu.memory_space<vmem>>, %arg9: memref<8x32xf32, #tpu.memory_space<vmem>>, %arg10: memref<8x32xf32, #tpu.memory_space<vmem>>) attributes {dimension_semantics = [#tpu.dimension_semantics<arbitrary>], iteration_bounds = array<i64: 8>, scalar_prefetch = 0 : i64, scratch_operands = 1 : i64, tpu.core_type = #tpu.core_type<tc>, window_params = [{transform_indices = @transform_0, window_bounds = array<i64: 1, 8, 1>}, {pipeline_mode = #tpu.pipeline_mode<synchronous>, transform_indices = @transform_1, window_bounds = array<i64: 8, 32>}, {pipeline_mode = #tpu.pipeline_mode<synchronous>, transform_indices = @transform_2, window_bounds = array<i64: 128, 32>}, {pipeline_mode = #tpu.pipeline_mode<synchronous>, transform_indices = @transform_3, window_bounds = array<i64: 64, 128>}, {pipeline_mode = #tpu.pipeline_mode<synchronous>, transform_indices = @transform_4, window_bounds = array<i64: 1, 128>}, {pipeline_mode = #tpu.pipeline_mode<synchronous>, transform_indices = @transform_5, window_bounds = array<i64: 32, 128>}, {pipeline_mode = #tpu.pipeline_mode<synchronous>, transform_indices = @transform_6, window_bounds = array<i64: 1, 128>}, {transform_indices = @transform_7, window_bounds = array<i64: 1, 8, 128>}, {pipeline_mode = #tpu.pipeline_mode<synchronous>, transform_indices = @transform_8, window_bounds = array<i64: 8, 32>}]} {
    %c0_i32 = arith.constant 0 : i32
    %0 = arith.cmpi eq, %arg0, %c0_i32 : i32
    %1 = arith.extui %0 : i1 to i32
    %c0_i32_0 = arith.constant 0 : i32
    %2 = arith.cmpi ne, %1, %c0_i32_0 : i32
    scf.if %2 {
      %c0_29 = arith.constant 0 : index
      %c0_30 = arith.constant 0 : index
      %61 = vector.load %arg2[%c0_29, %c0_30] : memref<8x32xf32, #tpu.memory_space<vmem>>, vector<8x32xf32>
      %c0_31 = arith.constant 0 : index
      %c0_32 = arith.constant 0 : index
      %62 = vector.load %arg10[%c0_31, %c0_32] : memref<8x32xf32, #tpu.memory_space<vmem>>, vector<8x32xf32>
      tpu.vector_store %arg10[%c0_31, %c0_32], %61 {strides = array<i32>} : memref<8x32xf32, #tpu.memory_space<vmem>>, vector<8x32xf32>,
    } else {
    }
    %c0 = arith.constant 0 : index
    %c0_1 = arith.constant 0 : index
    %c0_2 = arith.constant 0 : index
    %3 = vector.load %arg1[%c0, %c0_1, %c0_2] : memref<1x8x1xi32, #tpu.memory_space<vmem>>, vector<1x8x1xi32>
    %4 = vector.shape_cast %3 : vector<1x8x1xi32> to vector<8x1xi32>
    %5 = tpu.iota {dimensions = array<i32: 1>} : vector<8x128xi32>
    %6 = vector.broadcast %4 : vector<8x1xi32> to vector<8x128xi32>
    %7 = arith.cmpi eq, %6, %5 : vector<8x128xi32>
    %8 = arith.extui %7 : vector<8x128xi1> to vector<8x128xi32>
    %9 = arith.sitofp %8 : vector<8x128xi32> to vector<8x128xf32>
    %c0_3 = arith.constant 0 : index
    %c0_4 = arith.constant 0 : index
    %10 = vector.load %arg3[%c0_3, %c0_4] : memref<128x32xf32, #tpu.memory_space<vmem>>, vector<128x32xf32>
    %cst = arith.constant dense<0.000000e+00> : vector<8x32xf32>
    %11 = tpu.matmul %9, %10, %cst {dimension_numbers = #tpu.dot_dimension_numbers<[1], [0], [0], [1], [0, 0, 1, 1], [], []>} : vector<8x128xf32>, vector<128x32xf32>, vector<8x32xf32> -> vector<8x32xf32>
    %c0_5 = arith.constant 0 : index
    %c0_6 = arith.constant 0 : index
    %12 = vector.load %arg10[%c0_5, %c0_6] : memref<8x32xf32, #tpu.memory_space<vmem>>, vector<8x32xf32>
    %13 = tpu.concatenate %11, %12 in 1 : vector<8x32xf32>, vector<8x32xf32> -> vector<8x64xf32>
    %c0_7 = arith.constant 0 : index
    %c0_8 = arith.constant 0 : index
    %14 = vector.load %arg4[%c0_7, %c0_8] : memref<64x128xf32, #tpu.memory_space<vmem>>, vector<64x128xf32>
    %cst_9 = arith.constant dense<0.000000e+00> : vector<8x128xf32>
    %15 = tpu.matmul %13, %14, %cst_9 {dimension_numbers = #tpu.dot_dimension_numbers<[1], [0], [0], [1], [0, 0, 1, 1], [], []>} : vector<8x64xf32>, vector<64x128xf32>, vector<8x128xf32> -> vector<8x128xf32>
    %c0_10 = arith.constant 0 : index
    %c0_11 = arith.constant 0 : index
    %16 = vector.load %arg5[%c0_10, %c0_11] : memref<1x128xf32, #tpu.memory_space<vmem>>, vector<1x128xf32>
    %17 = vector.broadcast %16 : vector<1x128xf32> to vector<8x128xf32>
    %18 = arith.addf %15, %17 : vector<8x128xf32>
    %19 = vector.extract_strided_slice %18 {offsets = [0, 0], sizes = [8, 32], strides = [1, 1]} : vector<8x128xf32> to vector<8x32xf32>
    %20 = arith.negf %19 : vector<8x32xf32>
    %21 = math.exp %20 : vector<8x32xf32>
    %cst_12 = arith.constant 1.000000e+00 : f32
    %22 = vector.broadcast %cst_12 : f32 to vector<8x32xf32>
    %23 = arith.addf %22, %21 : vector<8x32xf32>
    %24 = arith.divf %22, %23 : vector<8x32xf32>
    %25 = vector.extract_strided_slice %18 {offsets = [0, 32], sizes = [8, 32], strides = [1, 1]} : vector<8x128xf32> to vector<8x32xf32>
    %26 = arith.negf %25 : vector<8x32xf32>
    %27 = math.exp %26 : vector<8x32xf32>
    %cst_13 = arith.constant 1.000000e+00 : f32
    %28 = vector.broadcast %cst_13 : f32 to vector<8x32xf32>
    %29 = arith.addf %28, %27 : vector<8x32xf32>
    %30 = arith.divf %28, %29 : vector<8x32xf32>
    %31 = vector.extract_strided_slice %18 {offsets = [0, 64], sizes = [8, 32], strides = [1, 1]} : vector<8x128xf32> to vector<8x32xf32>
    %32 = vector.extract_strided_slice %18 {offsets = [0, 96], sizes = [8, 32], strides = [1, 1]} : vector<8x128xf32> to vector<8x32xf32>
    %33 = arith.mulf %24, %32 : vector<8x32xf32>
    %34 = arith.addf %31, %33 : vector<8x32xf32>
    %35 = math.tanh %34 : vector<8x32xf32>
    %cst_14 = arith.constant 1.000000e+00 : f32
    %36 = vector.broadcast %cst_14 : f32 to vector<8x32xf32>
    %37 = arith.subf %36, %30 : vector<8x32xf32>
    %38 = arith.mulf %37, %35 : vector<8x32xf32>
    %39 = arith.mulf %30, %12 : vector<8x32xf32>
    %40 = arith.addf %38, %39 : vector<8x32xf32>
    %c0_15 = arith.constant 0 : index
    %c0_16 = arith.constant 0 : index
    %41 = vector.load %arg10[%c0_15, %c0_16] : memref<8x32xf32, #tpu.memory_space<vmem>>, vector<8x32xf32>
    tpu.vector_store %arg10[%c0_15, %c0_16], %40 {strides = array<i32>} : memref<8x32xf32, #tpu.memory_space<vmem>>, vector<8x32xf32>,
    %c0_17 = arith.constant 0 : index
    %c0_18 = arith.constant 0 : index
    %42 = vector.load %arg9[%c0_17, %c0_18] : memref<8x32xf32, #tpu.memory_space<vmem>>, vector<8x32xf32>
    tpu.vector_store %arg9[%c0_17, %c0_18], %40 {strides = array<i32>} : memref<8x32xf32, #tpu.memory_space<vmem>>, vector<8x32xf32>,
    %c0_19 = arith.constant 0 : index
    %c0_20 = arith.constant 0 : index
    %43 = vector.load %arg6[%c0_19, %c0_20] : memref<32x128xf32, #tpu.memory_space<vmem>>, vector<32x128xf32>
    %cst_21 = arith.constant dense<0.000000e+00> : vector<8x128xf32>
    %44 = tpu.matmul %40, %43, %cst_21 {dimension_numbers = #tpu.dot_dimension_numbers<[1], [0], [0], [1], [0, 0, 1, 1], [], []>} : vector<8x32xf32>, vector<32x128xf32>, vector<8x128xf32> -> vector<8x128xf32>
    %c0_22 = arith.constant 0 : index
    %c0_23 = arith.constant 0 : index
    %45 = vector.load %arg7[%c0_22, %c0_23] : memref<1x128xf32, #tpu.memory_space<vmem>>, vector<1x128xf32>
    %46 = vector.broadcast %45 : vector<1x128xf32> to vector<8x128xf32>
    %47 = arith.addf %44, %46 : vector<8x128xf32>
    %cst_24 = arith.constant dense<0xFF800000> : vector<8xf32>
    %48 = vector.multi_reduction <maximumf>, %47, %cst_24 [1] : vector<8x128xf32> to vector<8xf32>
    %49 = vector.shape_cast %48 : vector<8xf32> to vector<8x1xf32>
    %50 = vector.broadcast %49 : vector<8x1xf32> to vector<8x128xf32>
    %51 = arith.subf %47, %50 : vector<8x128xf32>
    %52 = math.exp %51 : vector<8x128xf32>
    %cst_25 = arith.constant dense<0.000000e+00> : vector<8xf32>
    %53 = vector.multi_reduction <add>, %52, %cst_25 [1] : vector<8x128xf32> to vector<8xf32>
    %54 = vector.shape_cast %53 : vector<8xf32> to vector<8x1xf32>
    %55 = math.log %54 : vector<8x1xf32>
    %56 = vector.broadcast %55 : vector<8x1xf32> to vector<8x128xf32>
    %57 = arith.subf %51, %56 : vector<8x128xf32>
    %c0_26 = arith.constant 0 : index
    %c0_27 = arith.constant 0 : index
    %c0_28 = arith.constant 0 : index
    %58 = vector.load %arg8[%c0_26, %c0_27, %c0_28] : memref<1x8x128xf32, #tpu.memory_space<vmem>>, vector<1x8x128xf32>
    %59 = vector.shape_cast %58 : vector<1x8x128xf32> to vector<8x128xf32>
    %60 = vector.shape_cast %57 : vector<8x128xf32> to vector<1x8x128xf32>
    tpu.vector_store %arg8[%c0_26, %c0_27, %c0_28], %60 {strides = array<i32>} : memref<1x8x128xf32, #tpu.memory_space<vmem>>, vector<1x8x128xf32>,
    return
  }
  func.func @transform_0(%arg0: i32) -> (i32, i32, i32) {
    %c0_i32 = arith.constant 0 : i32
    %c0_i32_0 = arith.constant 0 : i32
    %c0_i32_1 = arith.constant 0 : i32
    return %arg0, %c0_i32, %c0_i32_0 : i32, i32, i32
  }
  func.func @transform_1(%arg0: i32) -> (i32, i32) {
    %c0_i32 = arith.constant 0 : i32
    %c0_i32_0 = arith.constant 0 : i32
    %c0_i32_1 = arith.constant 0 : i32
    return %c0_i32, %c0_i32_0 : i32, i32
  }
  func.func @transform_2(%arg0: i32) -> (i32, i32) {
    %c0_i32 = arith.constant 0 : i32
    %c0_i32_0 = arith.constant 0 : i32
    %c0_i32_1 = arith.constant 0 : i32
    return %c0_i32, %c0_i32_0 : i32, i32
  }
  func.func @transform_3(%arg0: i32) -> (i32, i32) {
    %c0_i32 = arith.constant 0 : i32
    %c0_i32_0 = arith.constant 0 : i32
    %c0_i32_1 = arith.constant 0 : i32
    return %c0_i32, %c0_i32_0 : i32, i32
  }
  func.func @transform_4(%arg0: i32) -> (i32, i32) {
    %c0_i32 = arith.constant 0 : i32
    %c0_i32_0 = arith.constant 0 : i32
    %c0_i32_1 = arith.constant 0 : i32
    return %c0_i32, %c0_i32_0 : i32, i32
  }
  func.func @transform_5(%arg0: i32) -> (i32, i32) {
    %c0_i32 = arith.constant 0 : i32
    %c0_i32_0 = arith.constant 0 : i32
    %c0_i32_1 = arith.constant 0 : i32
    return %c0_i32, %c0_i32_0 : i32, i32
  }
  func.func @transform_6(%arg0: i32) -> (i32, i32) {
    %c0_i32 = arith.constant 0 : i32
    %c0_i32_0 = arith.constant 0 : i32
    %c0_i32_1 = arith.constant 0 : i32
    return %c0_i32, %c0_i32_0 : i32, i32
  }
  func.func @transform_7(%arg0: i32) -> (i32, i32, i32) {
    %c0_i32 = arith.constant 0 : i32
    %c0_i32_0 = arith.constant 0 : i32
    %c0_i32_1 = arith.constant 0 : i32
    return %arg0, %c0_i32, %c0_i32_0 : i32, i32, i32
  }
  func.func @transform_8(%arg0: i32) -> (i32, i32) {
    %c0_i32 = arith.constant 0 : i32
    %c0_i32_0 = arith.constant 0 : i32
    %c0_i32_1 = arith.constant 0 : i32
    return %c0_i32, %c0_i32_0 : i32, i32
  }
}

</mosaic_0001>

<bundles_post_ra>
// kernel: tpu_custom_call.1
= control target key start
LH: loop header
LB: loop body
LE: loop exit
PB: predicated region body
PF: predicated region fallthrough
CT: control target
= control target key end

     0   :  { %14 = vsyncpa [#allocation4], 0  ;;  %s1345_s0 = inlined_call_operand.vmem [shape: s32[8,8,1], index: 0, kind: input, shape index: {}]   ;;  %s1346_s1 = inlined_call_operand.vmem [shape: f32[8,32], index: 1, kind: input, shape index: {}]   ;;  %s1347_s2 = inlined_call_operand.vmem [shape: f32[128,32], index: 2, kind: input, shape index: {}]   ;;  %s1348_s3 = inlined_call_operand.vmem [shape: f32[64,128], index: 3, kind: input, shape index: {}]   ;;  %s1349_s4 = inlined_call_operand.vmem [shape: f32[1,128], index: 4, kind: input, shape index: {}]   ;;  %s1350_s5 = inlined_call_operand.vmem [shape: f32[32,128], index: 5, kind: input, shape index: {}]   ;;  %s1351_s6 = inlined_call_operand.vmem [shape: f32[1,128], index: 6, kind: input, shape index: {}]   ;;  %s1352_s7 = inlined_call_operand.hbm [shape: f32[8,8,128], index: 7, kind: output, shape index: {0}]   ;;  %s1353_s8 = inlined_call_operand.hbm [shape: f32[8,32], index: 8, kind: output, shape index: {1}]  }
   0x1   :  { %16 = vsyncpa [#allocation4 + $0x1], 0 }
   0x2   :  { %17 = vsyncpa [#allocation6], 0  ;;  %s1090_s27 = smov 0   ;;  %s1092_s28 = smov 0  }
   0x3   :  { %s1094_s29 = smov 0   ;;  %s1096_s30 = smov 0  }
   0x4 LB: > { %s1111_s9 = sadd.s32 4294967295, %s1033_s30   ;;  %s718_s10 = sadd.s32 4294967294, %s1033_s30   ;;  %s1033_s30 = sphi %s1096_s30, %s1359_s30   ;;  %s1029_s29 = sphi %s1094_s29, %s1358_s29   ;;  %s1025_s28 = sphi %s1092_s28, %s1357_s28   ;;  %s1021_s27 = sphi %s1090_s27, %s1356_s27  }
   0x5   : > { %s1115_s11 = sadd.s32 1, %s1033_s30   ;;  %s182_s12 = sadd.s32 1, %s1029_s29 }
   0x6   : > { %s179_s13 = ssub.s32 %s1033_s30, %s1115_s11  ;;  %p192_p0 = scmp.ne.s32.totalorder %s1029_s29, %s1025_s28 }
   0x7   : > { %p180_p1 = scmp.eq.s32.totalorder %s179_s13, 0  ;;  %p193_p2 = scmp.eq.s32.totalorder %s1111_s9, 7 }
   0x8   : > { %p198_p3 = scmp.ne.s32.totalorder %s1025_s28, %s1021_s27  ;;  %p199_p4 = scmp.eq.s32.totalorder %s718_s10, 7 }
   0x9   : > { %s1126_s14 = scalar_select %p180_p1, %s1029_s29, %s182_s12  }
   0xa   : > { %p1130_p5 = por %p193_p2, %p192_p0  ;;  %p1134_p6 = por %p199_p4, %p198_p3 }
   0xb   : > { %p721_p7 = scmp.ge.s32.totalorder %s1033_s30, 1  ;;  %p263_p8 = scmp.lt.s32.totalorder %s1033_s30, 9 }
   0xd   : > { %p264_p9 = pnand %p721_p7, %p263_p8 }
   0xe   : > { %s291_s17 = sand.u32 (!%p264_p9), 1, %s1025_s28   ;;  %p296_p10 = scmp.lt.s32.totalorder (!%p264_p9), %s1111_s9, 7 }
   0xf   : > { %267 = sbr.rel (%p264_p9) target bundleno = 1611 (0x64b), region = 48  ;;  %s1144_s18 = sshll.u32 (!%p264_p9), %s291_s17, 3 }
  0x10   : > { %s293_s24 = scalar_lea.vmem (!%p264_p9), [#allocation3], %s1144_s18  ;;  %p724_p11 = scmp.ne.s32.totalorder (!%p264_p9), %s1111_s9, 0 }
  0x16   : > { %s297_s19 = scalar_select %p296_p10, %s1111_s9, 7 }
  0x17   : > { %303 = sbr.rel (%p724_p11) target bundleno = 30 (0x1e), region = 52  ;;  %v304_v0 = vld [vmem:[%s1346_s1] sm:$0xff] (!%p724_p11)  ;;  %vm305_vm0 = vcmask (!%p724_p11), 261120  }
  0x18   : > { %s723_s20 = sshll.u32 %s297_s19, 3  ;;  %306 = vst.msk [vmem:[#allocation2] sm:$0xff] (!%p724_p11), %vm305_vm0, %v304_v0 }
  0x19   : > { %s299_s23 = scalar_lea.vmem %s1345_s0, %s723_s20 }
  0x1e PF: > { %v307_v1 = vld [vmem:[%s299_s23] sm:$0xff]  ;;  %v317_v3 = vld [vmem:[%s1347_s2 + $0x8] sm:$0xff]  ;;  %v1035_v4 = vmov 0   ;;  %v1036_v5 = vmov 0.0|0.0   ;;  %v318_v7 = vld [vmem:[%s1347_s2 + $0x10] sm:$0xff]  ;;  %vm1037_vm1 = vmmov 0   ;;  %v308_v42 = vlaneseq }
  0x1f   : > { %v316_v2 = vld [vmem:[%s1347_s2] sm:$0xff]  ;;  %930 = vset.pattern.permute.xlu0 %v1035_v4  ;;  %834 = vmatprep.subr.bf16.mxu0 %v1036_v5  ;;  %v319_v8 = vld [vmem:[%s1347_s2 + $0x18] sm:$0xff]  ;;  %v1038_v9 = vmov 0.0   ;;  %v321_v12 = vld [vmem:[%s1347_s2 + $0x28] sm:$0xff]  ;;  %s1039_s13 = smov 32   ;;  %v1040_v45 = vmov 1.0  }
  0x20   : > { %v835_v6 = vpack.c.bf16 %v317_v3, %v316_v2  ;;  %311 = vperm.xlu0 %930, %v307_v1   ;;  %801 = vmatprep.mubr.msk.f32.mxu0 %vm1037_vm1, %v1038_v9  ;;  %v838_v10 = vpack.c.bf16 %v319_v8, %v318_v7  ;;  %v320_v11 = vld [vmem:[%s1347_s2 + $0x20] sm:$0xff]  ;;  %v410_v15 = vld [vmem:[%s1348_s3 + $0x8] sm:$0xff]  ;;  %v411_v16 = vld [vmem:[%s1348_s3 + $0x10] sm:$0xff]  ;;  %v309_v43 = vand.u32 127, %v308_v42  ;;  %vm407_vm3 = vcmask 261120   ;;  %s1041_s21 = smov 64  }
  0x21   : > { %858 = vmatprep.subr.bf16.mxu1 %v1036_v5  ;;  %820 = vmatprep.mubr.msk.f32.mxu1 %vm1037_vm1, %v1038_v9  ;;  %v402_v13 = vld [vmem:[#allocation2] sm:$0xff]  ;;  %v841_v17 = vpack.c.bf16 %v321_v12, %v320_v11  ;;  %v412_v19 = vld [vmem:[%s1348_s3 + $0x18] sm:$0xff]  ;;  %v322_v20 = vld [vmem:[%s1347_s2 + $0x30] sm:$0xff]  ;;  %vm424_vm4 = vcmask 523264   ;;  %s1042_s20 = smov 96   ;;  %s1043_s23 = smov [#allocation5]  }
  0x22   : > { %836 = vmatpush3.bf16.msra.mxu0 %v835_v6  ;;  %v409_v14 = vld [vmem:[%s1348_s3] sm:$0xff]  ;;  %v323_v21 = vld [vmem:[%s1347_s2 + $0x38] sm:$0xff]  ;;  %v862_v22 = vpack.c.bf16 %v412_v19, %v411_v16  ;;  %v414_v24 = vld [vmem:[%s1348_s3 + $0x28] sm:$0xff]  ;;  %s648_s25 = sshll.u32 %s1043_s23, 4  ;;  %s649_s25 = int_to_ptr.vmem [resolvable:$true] %s648_s25 }
  0x23   : > { %837 = vmatprep.subr.bf16.mxu0 %v1036_v5  ;;  %v859_v18 = vpack.c.bf16 %v410_v15, %v409_v14  ;;  %v413_v23 = vld [vmem:[%s1348_s3 + $0x20] sm:$0xff]  ;;  %v844_v25 = vpack.c.bf16 %v323_v21, %v322_v20  ;;  %v325_v27 = vld [vmem:[%s1347_s2 + $0x48] sm:$0xff]  ;;  %v415_v29 = vld [vmem:[%s1348_s3 + $0x30] sm:$0xff]  ;;  %s941_s26 = scalar_lea.vmem %s649_s25, 128  ;;  %p948_p1 = scmp.lt.s32.totalorder %s649_s25, %s649_s25 }
  0x24   : > { %404 = vrot.lane.b32.xlu0 %v402_v13, %s1039_s13  ;;  %v324_v26 = vld [vmem:[%s1347_s2 + $0x40] sm:$0xff]  ;;  %v865_v28 = vpack.c.bf16 %v414_v24, %v413_v23  ;;  %v416_v30 = vld [vmem:[%s1348_s3 + $0x38] sm:$0xff]  ;;  %v326_v32 = vld [vmem:[%s1347_s2 + $0x50] sm:$0xff]  ;;  %p942_p12 = scmp.ne.s32.totalorder %s649_s25, %s941_s26  ;;  %p949_p3 = scmp.lt.s32.totalorder %s941_s26, %s941_s26 }
  0x25   : > { %860 = vmatpush3.bf16.msra.mxu1 %v859_v18  ;;  %v847_v31 = vpack.c.bf16 %v325_v27, %v324_v26  ;;  %v327_v33 = vld [vmem:[%s1347_s2 + $0x58] sm:$0xff]  ;;  %v868_v34 = vpack.c.bf16 %v416_v30, %v415_v29  ;;  %v328_v36 = vld [vmem:[%s1347_s2 + $0x60] sm:$0xff]  ;;  %v329_v37 = vld [vmem:[%s1347_s2 + $0x68] sm:$0xff] }
  0x26   : > { %839 = vmatpush3.bf16.msra.mxu0 %v838_v10  ;;  %861 = vmatprep.subr.bf16.mxu1 %v1036_v5  ;;  %v850_v35 = vpack.c.bf16 %v327_v33, %v326_v32  ;;  %v853_v38 = vpack.c.bf16 %v329_v37, %v328_v36  ;;  %v330_v39 = vld [vmem:[%s1347_s2 + $0x70] sm:$0xff]  ;;  %v331_v40 = vld [vmem:[%s1347_s2 + $0x78] sm:$0xff]  ;;  %v727_v50 = vld [vmem:[%s1349_s4] ss:$0 sm:$0xff]  ;;  %p943_p13 = pnand %p942_p12, %p193_p2  ;;  %p950_p4 = por %p949_p3, %p948_p1 }
  0x27   : > { %840 = vmatprep.subr.bf16.mxu0 %v1036_v5  ;;  %v856_v41 = vpack.c.bf16 %v331_v40, %v330_v39  ;;  %v529_v62 = vld [vmem:[%s1350_s5] sm:$0xff]  ;;  %v530_v63 = vld [vmem:[%s1350_s5 + $0x8] sm:$0xff]  ;;  %v531_v0 = vld [vmem:[%s1350_s5 + $0x10] sm:$0xff] }
  0x28   : > { %v871_v1 = vpack.c.bf16 %v530_v63, %v529_v62  ;;  %v532_v2 = vld [vmem:[%s1350_s5 + $0x18] sm:$0xff]  ;;  %p944_p0 = pneg %p943_p13 }
  0x29   : > { %863 = vmatpush3.bf16.msra.mxu1 %v862_v22  ;;  %v874_v3 = vpack.c.bf16 %v532_v2, %v531_v0 }
  0x2a   : > { %842 = vmatpush3.bf16.msra.mxu0 %v841_v17  ;;  %864 = vmatprep.subr.bf16.mxu1 %v1036_v5  ;;  %p951_p7 = pnand %p950_p4, %p944_p0 }
  0x2b   : > { %843 = vmatprep.subr.bf16.mxu0 %v1036_v5 }
  0x2d   : > { %866 = vmatpush3.bf16.msra.mxu1 %v865_v28 }
  0x2e   : > { %845 = vmatpush3.bf16.msra.mxu0 %v844_v25  ;;  %867 = vmatprep.subr.bf16.mxu1 %v1036_v5 }
  0x2f   : > { %846 = vmatprep.subr.bf16.mxu0 %v1036_v5 }
  0x31   : > { %869 = vmatpush3.bf16.msra.mxu1 %v868_v34 }
  0x32   : > { %848 = vmatpush3.bf16.msra.mxu0 %v847_v31  ;;  %870 = vmatprep.subr.bf16.mxu1 %v1036_v5 }
  0x33   : > { %849 = vmatprep.subr.bf16.mxu0 %v1036_v5 }
  0x36   : > { %851 = vmatpush3.bf16.msra.mxu0 %v850_v35 }
  0x37   : > { %852 = vmatprep.subr.bf16.mxu0 %v1036_v5 }
  0x3a   : > { %854 = vmatpush3.bf16.msra.mxu0 %v853_v38 }
  0x3b   : > { %855 = vmatprep.subr.bf16.mxu0 %v1036_v5 }
  0x3e   : > { %857 = vmatpush3.bf16.msra.mxu0 %v856_v41 }
  0x9f   : > { %v312_v44 = vpop.permute.xlu0 %311 }
  0xa0   : > { %vm313_vm2 = vcmp.eq.s32.totalorder %v312_v44, %v309_v43 }
  0xa1   : > { %802 = vmatmul.mubr.msk.f32.vlgmr.msra.gmra.mrb[0].mxu0 %vm313_vm2, %v1040_v45 }
  0xa3   : > { %v405_v46 = vpop.permute.xlu0 %404 }
 0x174   : > { %v398_v47 = vpop.f32.mrb[0].mxu0 }
 0x175   : > { %v408_v48 = vsel %vm407_vm3, %v398_v47, %v405_v46  ;;  %v803_v49 = vpop.f32.mrb[1].mxu0 }
 0x176   : > { %821 = vmatmul.mubr.msk.f32.vlgmr.msra.gmra.mrb[0].mxu1 %vm424_vm4, %v408_v48 }
 0x177   : > { %831 = vmatprep.mubr.msk.f32.mxu1 %vm1037_vm1, %v1038_v9  ;;  %872 = vmatpush3.bf16.msra.mxu1 %v871_v1 }
 0x178   : > { %873 = vmatprep.subr.bf16.mxu1 %v1036_v5  ;;  %v730_v5 = vld [vmem:[%s1351_s6] ss:$0 sm:$0xff] }
 0x17b   : > { %875 = vmatpush3.bf16.msra.mxu1 %v874_v3 }
 0x249   : > { %v494_v51 = vpop.f32.mrb[0].mxu1 }
 0x24a   : > { %v495_v52 = vadd.f32 %v727_v50, %v494_v51  ;;  %v822_v53 = vpop.f32.mrb[1].mxu1 }
 0x24c   : > { %505 = vrot.lane.b32.xlu1 %v495_v52, %s1039_s13  ;;  %v729_v54 = vmul.f32 -1.442695, %v495_v52 }
 0x24e   : > { %931 = vpow2.f32 %v729_v54 }
 0x258   : > { %v932_v55 = vpop.eup %931 }
 0x259   : > { %v501_v56 = vadd.f32 1.0, %v932_v55 }
 0x25b   : > { %933 = vrcp.f32 %v501_v56 }
 0x265   : > { %v934_v57 = vpop.eup %933 }
 0x266   : > { %v515_v6 = vsub.f32 1.0, %v934_v57  ;;  %v521_v8 = vmul.f32 %v934_v57, %v405_v46 }
 0x2be   : > { %v506_v58 = vpop.permute.xlu1 %505 }
 0x2bf   : > { %v508_v59 = vmul.f32 %v934_v57, %v506_v58 }
 0x2c1   : > { %510 = vrot.lane.b32.xlu1 %v508_v59, %s1041_s21 }
 0x333   : > { %v511_v60 = vpop.permute.xlu1 %510 }
 0x334   : > { %v513_v61 = vadd.f32 %v511_v60, %v495_v52 }
 0x336   : > { %935 = vtanh.f32 %v513_v61 }
 0x340   : > { %v936_v4 = vpop.eup %935 }
 0x341   : > { %517 = vrot.lane.b32.xlu0 %v936_v4, %s1042_s20 }
 0x3b3   : > { %v518_v7 = vpop.permute.xlu0 %517 }
 0x3b4   : > { %v520_v9 = vmul.f32 %v518_v7, %v515_v6 }
 0x3b6   : > { %v522_v10 = vadd.f32 %v521_v8, %v520_v9 }
 0x3b8   : > { %524 = vrot.lane.b32.xlu1 %v522_v10, %s1042_s20 }
 0x42a   : > { %v525_v11 = vpop.permute.xlu1 %524 }
 0x42b   : > { %527 = vst.msk [vmem:[#allocation2] sm:$0xff] %vm407_vm3, %v525_v11  ;;  %528 = vst.msk [vmem:[#allocation5] sm:$0xff] %vm407_vm3, %v525_v11  ;;  %832 = vmatmul.mubr.msk.f32.vlgmr.msra.gmra.mrb[2].mxu1 %vm407_vm3, %v525_v11 }
 0x4fe   : > { %v608_v12 = vpop.f32.mrb[2].mxu1 }
 0x4ff   : > { %v609_v13 = vadd.f32 %v730_v5, %v608_v12  ;;  %v833_v14 = vpop.f32.mrb[3].mxu1 }
 0x501   : > { %612 = vmax.xlane.f32.xlu0 %v609_v13 }
 0x58e   : > { %v613_v15 = vpop.xlane.xlu0 %612 }
 0x58f   : > { %v614_v16 = vsub.f32 %v609_v13, %v613_v15 }
 0x591   : > { %v615_v17 = vmul.f32 1.442695, %v614_v16 }
 0x593   : > { %937 = vpow2.f32 %v615_v17 }
 0x59d   : > { %v938_v18 = vpop.eup %937 }
 0x59e   : > { %617 = vadd.xlane.f32.xlu1 %v938_v18 }
 0x59f   : > { %954 = shalt.err (!%p951_p7)
}
 0x5a0   : > { %s955_s12 = scalar_lea.hbm %s1353_s8, 128 }
 0x5a1   : > { %p956_p8 = scmp.ne.s32.totalorder %s1353_s8, %s955_s12  ;;  %p961_p11 = scmp.lt.u32.totalorder %s955_s12, %s1353_s8 }
 0x5a3   : > { %p957_p9 = pnand %p956_p8, %p193_p2 }
 0x5a5   : > { %p958_p10 = pneg %p957_p9 }
 0x5a7   : > { %p963_p12 = pnand %p961_p11, %p958_p10 }
 0x5a9   : > { %966 = shalt.err (!%p963_p12)
}
 0x5aa   : > { %878 = dma.vmem_to_hbm [thread:$0]  (%p193_p2), %s649_s25, 128, %s1353_s8, [#allocation6]  }
 0x5ab   : > { %s733_s13 = sshll.u32 %s1111_s9, 7  ;;  %s637_s10 = sshll.u32 %s293_s24, 4  ;;  %s1297_s10 = int_to_ptr.vmem [resolvable:$true] %s637_s10 }
 0x5ac   : > { %s1295_s20 = scalar_lea.hbm %s1352_s7, %s733_s13  ;;  %s624_s25 = scalar_lea.sflag [#allocation4], %s291_s17 }
 0x5ad   : > { %s967_s21 = scalar_lea.vmem %s1297_s10, 128  ;;  %s1044_s22 = smov [#allocation3]  }
 0x5ae   : > { %p968_p13 = scmp.ne.s32.totalorder %s1297_s10, %s967_s21  ;;  %s971_s23 = sshll.u32 %s1044_s22, 4  ;;  %s972_s23 = int_to_ptr.vmem [resolvable:$false] %s971_s23 }
 0x5af   : > { %s973_s26 = scalar_lea.vmem %s972_s23, 256  ;;  %p974_p3 = scmp.lt.s32.totalorder %s1297_s10, %s972_s23 }
 0x5b0   : > { %p969_p0 = pnand %p968_p13, %p1130_p5  ;;  %p975_p4 = scmp.lt.s32.totalorder %s973_s26, %s967_s21 }
 0x5b2   : > { %p970_p1 = pneg %p969_p0  ;;  %p976_p7 = por %p975_p4, %p974_p3 }
 0x5b4   : > { %p977_p8 = pnand %p976_p7, %p970_p1 }
 0x62b   : > { %v618_v19 = vpop.xlane.xlu1 %617 }
 0x62c   : > { %939 = vlog2.f32 %v618_v19 }
 0x636   : > { %v940_v20 = vpop.eup %939 }
 0x637   : > { %v620_v21 = vmul.f32 0.6931472, %v940_v20 }
 0x639   : > { %v621_v22 = vsub.f32 %v614_v16, %v620_v21 }
 0x63b   : > { %622 = vst [vmem:[%s293_s24] sm:$0xff] %v621_v22 }
 0x63c   : > { %980 = shalt.err (!%p977_p8)
}
 0x63d   : > { %s981_s17 = scalar_lea.hbm %s1295_s20, 128  ;;  %s985_s13 = scalar_lea.hbm %s1352_s7, 1024 }
 0x63e   : > { %p982_p9 = scmp.ne.s32.totalorder %s1295_s20, %s981_s17  ;;  %p986_p12 = scmp.lt.u32.totalorder %s1295_s20, %s1352_s7 }
 0x63f   : > { %p987_p13 = scmp.lt.u32.totalorder %s985_s13, %s981_s17  ;;  %p989_p1 = scmp.lt.u32.totalorder %s981_s17, %s1295_s20 }
 0x640   : > { %p983_p10 = pnand %p982_p9, %p1130_p5 }
 0x641   : > { %p988_p0 = por %p987_p13, %p986_p12 }
 0x642   : > { %p984_p11 = pneg %p983_p10 }
 0x643   : > { %p990_p3 = por %p989_p1, %p988_p0 }
 0x645   : > { %p991_p4 = pnand %p990_p3, %p984_p11 }
 0x647   : > { %994 = shalt.err (!%p991_p4)
}
 0x648   : > { %876 = dma.vmem_to_hbm [thread:$0]  (%p1130_p5), %s1297_s10, 128, %s1295_s20, %s624_s25  }
 0x649   : > { %1012 = dma.done.wait (%p193_p2), [#allocation6], 128  }
 0x64a   : > { %1014 = vsyncadd (%p193_p2), [#allocation6], 4294967168 }
 0x64b PF: > { %p888_p7 = scmp.ge.s32.totalorder %s1033_s30, 2  ;;  %s664_s21 = sand.u32 1, %s1021_s27  }
 0x64c   : > { %s665_s22 = scalar_lea.sflag [#allocation4], %s664_s21 }
 0x64d   : > { %p883_p8 = pnand %p888_p7, %p1134_p6 }
 0x64f   : > { %1016 = dma.done.wait (!%p883_p8), %s665_s22, 128  }
 0x650   : > { %1018 = vsyncadd (!%p883_p8), %s665_s22, 4294967168  ;;  %p20_p5 = scmp.ge.s32.totalorder %s1115_s11, 10   ;;  %s1356_s27 = smov %s1025_s28 }
 0x651   : > { %s1357_s28 = smov %s1029_s29  ;;  %s1358_s29 = smov %s1126_s14 }
 0x652   : > { %s1359_s30 = smov %s1115_s11  ;;  %22 = sbr.rel (!%p20_p5) target bundleno = 4 (0x4), region = 95 }
 0x659   :  { %670 = vsyncpa [#allocation4], 1 }
 0x65a   :  { %672 = vsyncpa [#allocation4 + $0x1], 1 }
 0x65b   :  { %673 = vsyncpa [#allocation6], 1 }

</bundles_post_ra>
